<compile_context>
chip_gen: v5e
topology: v5e:2x2
jax: 0.10.0
libtpu: 0.0.40
codegen_flags: <defaults>
</compile_context>

<pallas_src>
import functools
import math

import jax
import jax.numpy as jnp
from jax import lax
from jax.experimental import pallas as pl
from jax.experimental.pallas import tpu as pltpu


def _i32(v):
    """Wrap a Python int into signed int32 range (for hash constants)."""
    v &= 0xFFFFFFFF
    return v - (1 << 32) if v >= (1 << 31) else v


# Bob Jenkins' 32-bit mix constants (add/xor/shift mixer, no int multiplies).
_J1 = _i32(0x7ED55D16)
_J2 = _i32(0xC761C23C)
_J3 = _i32(0x165667B1)
_J4 = _i32(0xD3A2646C)
_J5 = _i32(0xFD7046C5)
_J6 = _i32(0xB55A4F09)
_GOLD = _i32(0x9E3779B1)


def _round_up(a, m):
    return (a + m - 1) // m * m


def _shake_block_kernel(seed_ref, x_ref, w1_ref, b1_ref, w2_ref, b2_ref,
                        o_ref, *, training: bool):
    """Fused: two pointwise-conv+ReLU branches + ShakeShake mix."""
    x = x_ref[...]                         # (bn, Cin, T)   f32
    w1 = w1_ref[...]                       # (1, Cout, Cin)
    w2 = w2_ref[...]
    bn, c_in, t = x.shape
    c_out = w1.shape[1]

    # 1x1 conv over channels = Cin broadcast-FMA accumulations on the VPU.
    # Channels live on sublanes, flattened H*W on lanes -> lane-dense output.
    xc = x[:, 0:1, :]                      # (bn, 1, T)
    h1 = xc * w1[:, :, 0:1]                # (bn, Cout, T)
    h2 = xc * w2[:, :, 0:1]
    for cin_idx in range(1, c_in):         # small C: fully unrolled
        xc = x[:, cin_idx:cin_idx + 1, :]
        h1 = h1 + xc * w1[:, :, cin_idx:cin_idx + 1]
        h2 = h2 + xc * w2[:, :, cin_idx:cin_idx + 1]
    h1 = jnp.maximum(h1 + b1_ref[...], 0.0)
    h2 = jnp.maximum(h2 + b2_ref[...], 0.0)

    if training:
        # Per-element alpha ~ U[0,1): stateless hash of (seed, tile, index).
        shape = (bn, c_out, t)
        bi = lax.broadcasted_iota(jnp.int32, shape, 0)
        chi = lax.broadcasted_iota(jnp.int32, shape, 1)
        li = lax.broadcasted_iota(jnp.int32, shape, 2)
        tile_id = pl.program_id(0) * pl.num_programs(1) + pl.program_id(1)
        salt = tile_id * jnp.int32(_GOLD) + seed_ref[0]        # scalar ops
        k = (li ^ (chi << 14) ^ (bi << 20)) + salt
        # Jenkins-style avalanche (right shifts are arithmetic here, which is
        # fine for mixing; all ops are plain int32 add/xor/shift).
        k = (k + jnp.int32(_J1)) + (k << 12)
        k = (k ^ jnp.int32(_J2)) ^ (k >> 19)
        k = (k + jnp.int32(_J3)) + (k << 5)
        k = (k + jnp.int32(_J4)) ^ (k << 9)
        k = (k + jnp.int32(_J5)) + (k << 3)
        k = (k ^ jnp.int32(_J6)) ^ (k >> 16)
        mant = k & jnp.int32(0x7FFFFF)                         # 23 bits
        alpha = mant.astype(jnp.float32) * (1.0 / float(1 << 23))
        out = alpha * h1 + (1.0 - alpha) * h2
    else:
        out = 0.5 * (h1 + h2)              # eval: no alpha materialized

    o_ref[...] = out.astype(o_ref.dtype)


def shake_block(x_nchw, w1, b1, w2, b2, seed, *, training=True,
                max_lane_tile=8192, target_tile_elems=256 * 1024):
    """ShakeBlock forward.

    x_nchw : [N, Cin, H, W] float32 (PyTorch layout; used as-is, no transpose)
    w1, w2 : [Cout, Cin] 1x1-conv weights (PyTorch orientation)
    b1, b2 : [Cout]
    """
    N, C, H, W = x_nchw.shape
    c_out, c_in = w1.shape
    assert c_in == C
    HW = H * W

    # Lane tile: multiple of 128, capped so an f32 (C, t_hw) slab stays small.
    lane_budget = max(
        128, ((2 * 1024 * 1024) // (4 * max(C, c_out))) // 128 * 128)
    t_hw = min(max_lane_tile, lane_budget, _round_up(HW, 128))
    hw_pad = _round_up(HW, t_hw)
    # Batch rows per tile (always divides N; handles any N without asserts).
    bn = math.gcd(N, max(1, target_tile_elems // (max(C, c_out) * t_hw)))

    x3 = x_nchw.reshape(N, C, HW)
    if hw_pad != HW:
        x3 = jnp.pad(x3, ((0, 0), (0, 0), (0, hw_pad - HW)))

    w1k = w1.reshape(1, c_out, c_in).astype(jnp.float32)
    w2k = w2.reshape(1, c_out, c_in).astype(jnp.float32)
    b1k = b1.reshape(1, c_out, 1).astype(jnp.float32)
    b2k = b2.reshape(1, c_out, 1).astype(jnp.float32)
    seed_arr = jnp.asarray([seed], dtype=jnp.int32)

    grid = (N // bn, hw_pad // t_hw)

    out3 = pl.pallas_call(
        functools.partial(_shake_block_kernel, training=training),
        out_shape=jax.ShapeDtypeStruct((N, c_out, hw_pad), x_nchw.dtype),
        grid_spec=pltpu.PrefetchScalarGridSpec(
            num_scalar_prefetch=1,                     # seed -> SMEM
            grid=grid,
            in_specs=[
                pl.BlockSpec((bn, C, t_hw), lambda n, t, seed: (n, 0, t)),
                pl.BlockSpec((1, c_out, c_in), lambda n, t, seed: (0, 0, 0)),
                pl.BlockSpec((1, c_out, 1), lambda n, t, seed: (0, 0, 0)),
                pl.BlockSpec((1, c_out, c_in), lambda n, t, seed: (0, 0, 0)),
                pl.BlockSpec((1, c_out, 1), lambda n, t, seed: (0, 0, 0)),
            ],
            out_specs=pl.BlockSpec((bn, c_out, t_hw),
                                   lambda n, t, seed: (n, 0, t)),
        ),
        compiler_params=pltpu.CompilerParams(
            # Stateless hash PRNG -> grid iterations independent; lets the
            # grid shard across both v7x TensorCores, neutral on v5e/v6e.
            dimension_semantics=("parallel", "parallel"),
            vmem_limit_bytes=32 * 1024 * 1024),
    )(seed_arr, x3, w1k, b1k, w2k, b2k)

    return out3[:, :, :HW].reshape(N, c_out, H, W)


def _branch_ref(x_nchw, w, b):
    """Pure-JAX reference for one branch: 1x1 conv + bias + ReLU."""
    y = jnp.einsum("oc,nchw->nohw", w, x_nchw) + b[None, :, None, None]
    return jnp.maximum(y, 0.0)


if __name__ == "__main__":
    key = jax.random.PRNGKey(0)
    kx, kw1, kb1, kw2, kb2 = jax.random.split(key, 5)

    N, C, H, W = 2, 4, 16, 16
    x = jax.random.normal(kx, (N, C, H, W), jnp.float32)

    # Deterministic branch parameters: Conv2d(C, C, 1) weights [Cout, Cin].
    w1 = jax.random.normal(kw1, (C, C), jnp.float32) * 0.1
    b1 = jax.random.normal(kb1, (C,), jnp.float32) * 0.1
    w2 = jax.random.normal(kw2, (C, C), jnp.float32) * 0.1
    b2 = jax.random.normal(kb2, (C,), jnp.float32) * 0.1

    h1 = _branch_ref(x, w1, b1)
    h2 = _branch_ref(x, w2, b2)

    # Eval mode: deterministic, alpha = 0.5, check against reference.
    out_eval = shake_block(x, w1, b1, w2, b2, seed=0, training=False)
    jax.block_until_ready(out_eval)
    assert out_eval.shape == (N, C, H, W)
    assert jnp.allclose(out_eval, 0.5 * (h1 + h2), atol=1e-5, rtol=1e-5)

    # Training mode: per-element alpha in [0,1); output must lie in the
    # elementwise convex hull of the two branch outputs.
    out_train = shake_block(x, w1, b1, w2, b2, seed=1234, training=True)
    jax.block_until_ready(out_train)
    lo = jnp.minimum(h1, h2) - 1e-5
    hi = jnp.maximum(h1, h2) + 1e-5
    assert bool(jnp.all((out_train >= lo) & (out_train <= hi)))

    print("KERNEL_OK")
</pallas_src>

<mosaic_0001>
module attributes {stable_mosaic.version = 11 : i64} {
  func.func @_shake_block_kernel(%arg0: i32, %arg1: i32, %arg2: memref<1xi32, #tpu.memory_space<smem>>, %arg3: memref<2x4x256xf32, #tpu.memory_space<vmem>>, %arg4: memref<1x4x4xf32, #tpu.memory_space<vmem>>, %arg5: memref<1x4x1xf32, #tpu.memory_space<vmem>>, %arg6: memref<1x4x4xf32, #tpu.memory_space<vmem>>, %arg7: memref<1x4x1xf32, #tpu.memory_space<vmem>>, %arg8: memref<2x4x256xf32, #tpu.memory_space<vmem>>) attributes {dimension_semantics = [#tpu.dimension_semantics<parallel>, #tpu.dimension_semantics<parallel>], iteration_bounds = array<i64: 1, 1>, scalar_prefetch = 1 : i64, scratch_operands = 0 : i64, tpu.core_type = #tpu.core_type<tc>, window_params = [{transform_indices = @transform_0, window_bounds = array<i64: 2, 4, 256>}, {pipeline_mode = #tpu.pipeline_mode<synchronous>, transform_indices = @transform_1, window_bounds = array<i64: 1, 4, 4>}, {pipeline_mode = #tpu.pipeline_mode<synchronous>, transform_indices = @transform_2, window_bounds = array<i64: 1, 4, 1>}, {pipeline_mode = #tpu.pipeline_mode<synchronous>, transform_indices = @transform_3, window_bounds = array<i64: 1, 4, 4>}, {pipeline_mode = #tpu.pipeline_mode<synchronous>, transform_indices = @transform_4, window_bounds = array<i64: 1, 4, 1>}, {transform_indices = @transform_5, window_bounds = array<i64: 2, 4, 256>}]} {
    %c0 = arith.constant 0 : index
    %c0_0 = arith.constant 0 : index
    %c0_1 = arith.constant 0 : index
    %0 = vector.load %arg3[%c0, %c0_0, %c0_1] : memref<2x4x256xf32, #tpu.memory_space<vmem>>, vector<2x4x256xf32>
    %c0_2 = arith.constant 0 : index
    %c0_3 = arith.constant 0 : index
    %c0_4 = arith.constant 0 : index
    %1 = vector.load %arg4[%c0_2, %c0_3, %c0_4] : memref<1x4x4xf32, #tpu.memory_space<vmem>>, vector<1x4x4xf32>
    %c0_5 = arith.constant 0 : index
    %c0_6 = arith.constant 0 : index
    %c0_7 = arith.constant 0 : index
    %2 = vector.load %arg6[%c0_5, %c0_6, %c0_7] : memref<1x4x4xf32, #tpu.memory_space<vmem>>, vector<1x4x4xf32>
    %3 = vector.extract_strided_slice %0 {offsets = [0, 0, 0], sizes = [2, 1, 256], strides = [1, 1, 1]} : vector<2x4x256xf32> to vector<2x1x256xf32>
    %4 = vector.extract_strided_slice %1 {offsets = [0, 0, 0], sizes = [1, 4, 1], strides = [1, 1, 1]} : vector<1x4x4xf32> to vector<1x4x1xf32>
    %5 = vector.broadcast %3 : vector<2x1x256xf32> to vector<2x4x256xf32>
    %6 = vector.broadcast %4 : vector<1x4x1xf32> to vector<2x4x256xf32>
    %7 = arith.mulf %5, %6 : vector<2x4x256xf32>
    %8 = vector.extract_strided_slice %2 {offsets = [0, 0, 0], sizes = [1, 4, 1], strides = [1, 1, 1]} : vector<1x4x4xf32> to vector<1x4x1xf32>
    %9 = vector.broadcast %3 : vector<2x1x256xf32> to vector<2x4x256xf32>
    %10 = vector.broadcast %8 : vector<1x4x1xf32> to vector<2x4x256xf32>
    %11 = arith.mulf %9, %10 : vector<2x4x256xf32>
    %12 = vector.extract_strided_slice %0 {offsets = [0, 1, 0], sizes = [2, 1, 256], strides = [1, 1, 1]} : vector<2x4x256xf32> to vector<2x1x256xf32>
    %13 = vector.extract_strided_slice %1 {offsets = [0, 0, 1], sizes = [1, 4, 1], strides = [1, 1, 1]} : vector<1x4x4xf32> to vector<1x4x1xf32>
    %14 = vector.broadcast %12 : vector<2x1x256xf32> to vector<2x4x256xf32>
    %15 = vector.broadcast %13 : vector<1x4x1xf32> to vector<2x4x256xf32>
    %16 = arith.mulf %14, %15 : vector<2x4x256xf32>
    %17 = arith.addf %7, %16 : vector<2x4x256xf32>
    %18 = vector.extract_strided_slice %2 {offsets = [0, 0, 1], sizes = [1, 4, 1], strides = [1, 1, 1]} : vector<1x4x4xf32> to vector<1x4x1xf32>
    %19 = vector.broadcast %12 : vector<2x1x256xf32> to vector<2x4x256xf32>
    %20 = vector.broadcast %18 : vector<1x4x1xf32> to vector<2x4x256xf32>
    %21 = arith.mulf %19, %20 : vector<2x4x256xf32>
    %22 = arith.addf %11, %21 : vector<2x4x256xf32>
    %23 = vector.extract_strided_slice %0 {offsets = [0, 2, 0], sizes = [2, 1, 256], strides = [1, 1, 1]} : vector<2x4x256xf32> to vector<2x1x256xf32>
    %24 = vector.extract_strided_slice %1 {offsets = [0, 0, 2], sizes = [1, 4, 1], strides = [1, 1, 1]} : vector<1x4x4xf32> to vector<1x4x1xf32>
    %25 = vector.broadcast %23 : vector<2x1x256xf32> to vector<2x4x256xf32>
    %26 = vector.broadcast %24 : vector<1x4x1xf32> to vector<2x4x256xf32>
    %27 = arith.mulf %25, %26 : vector<2x4x256xf32>
    %28 = arith.addf %17, %27 : vector<2x4x256xf32>
    %29 = vector.extract_strided_slice %2 {offsets = [0, 0, 2], sizes = [1, 4, 1], strides = [1, 1, 1]} : vector<1x4x4xf32> to vector<1x4x1xf32>
    %30 = vector.broadcast %23 : vector<2x1x256xf32> to vector<2x4x256xf32>
    %31 = vector.broadcast %29 : vector<1x4x1xf32> to vector<2x4x256xf32>
    %32 = arith.mulf %30, %31 : vector<2x4x256xf32>
    %33 = arith.addf %22, %32 : vector<2x4x256xf32>
    %34 = vector.extract_strided_slice %0 {offsets = [0, 3, 0], sizes = [2, 1, 256], strides = [1, 1, 1]} : vector<2x4x256xf32> to vector<2x1x256xf32>
    %35 = vector.extract_strided_slice %1 {offsets = [0, 0, 3], sizes = [1, 4, 1], strides = [1, 1, 1]} : vector<1x4x4xf32> to vector<1x4x1xf32>
    %36 = vector.broadcast %34 : vector<2x1x256xf32> to vector<2x4x256xf32>
    %37 = vector.broadcast %35 : vector<1x4x1xf32> to vector<2x4x256xf32>
    %38 = arith.mulf %36, %37 : vector<2x4x256xf32>
    %39 = arith.addf %28, %38 : vector<2x4x256xf32>
    %40 = vector.extract_strided_slice %2 {offsets = [0, 0, 3], sizes = [1, 4, 1], strides = [1, 1, 1]} : vector<1x4x4xf32> to vector<1x4x1xf32>
    %41 = vector.broadcast %34 : vector<2x1x256xf32> to vector<2x4x256xf32>
    %42 = vector.broadcast %40 : vector<1x4x1xf32> to vector<2x4x256xf32>
    %43 = arith.mulf %41, %42 : vector<2x4x256xf32>
    %44 = arith.addf %33, %43 : vector<2x4x256xf32>
    %c0_8 = arith.constant 0 : index
    %c0_9 = arith.constant 0 : index
    %c0_10 = arith.constant 0 : index
    %45 = vector.load %arg5[%c0_8, %c0_9, %c0_10] : memref<1x4x1xf32, #tpu.memory_space<vmem>>, vector<1x4x1xf32>
    %46 = vector.broadcast %45 : vector<1x4x1xf32> to vector<2x4x256xf32>
    %47 = arith.addf %39, %46 : vector<2x4x256xf32>
    %cst = arith.constant 0.000000e+00 : f32
    %48 = vector.broadcast %cst : f32 to vector<2x4x256xf32>
    %49 = arith.maximumf %47, %48 : vector<2x4x256xf32>
    %c0_11 = arith.constant 0 : index
    %c0_12 = arith.constant 0 : index
    %c0_13 = arith.constant 0 : index
    %50 = vector.load %arg7[%c0_11, %c0_12, %c0_13] : memref<1x4x1xf32, #tpu.memory_space<vmem>>, vector<1x4x1xf32>
    %51 = vector.broadcast %50 : vector<1x4x1xf32> to vector<2x4x256xf32>
    %52 = arith.addf %44, %51 : vector<2x4x256xf32>
    %cst_14 = arith.constant 0.000000e+00 : f32
    %53 = vector.broadcast %cst_14 : f32 to vector<2x4x256xf32>
    %54 = arith.maximumf %52, %53 : vector<2x4x256xf32>
    %55 = arith.addf %49, %54 : vector<2x4x256xf32>
    %cst_15 = arith.constant 5.000000e-01 : f32
    %56 = vector.broadcast %cst_15 : f32 to vector<2x4x256xf32>
    %57 = arith.mulf %56, %55 : vector<2x4x256xf32>
    %c0_16 = arith.constant 0 : index
    %c0_17 = arith.constant 0 : index
    %c0_18 = arith.constant 0 : index
    %58 = vector.load %arg8[%c0_16, %c0_17, %c0_18] : memref<2x4x256xf32, #tpu.memory_space<vmem>>, vector<2x4x256xf32>
    tpu.vector_store %arg8[%c0_16, %c0_17, %c0_18], %57 {strides = array<i32>} : memref<2x4x256xf32, #tpu.memory_space<vmem>>, vector<2x4x256xf32>,
    return
  }
  func.func @transform_0(%arg0: i32, %arg1: i32, %arg2: memref<1xi32, #tpu.memory_space<smem>>) -> (i32, i32, i32) {
    %c0_i32 = arith.constant 0 : i32
    %c0_i32_0 = arith.constant 0 : i32
    return %arg0, %c0_i32, %arg1 : i32, i32, i32
  }
  func.func @transform_1(%arg0: i32, %arg1: i32, %arg2: memref<1xi32, #tpu.memory_space<smem>>) -> (i32, i32, i32) {
    %c0_i32 = arith.constant 0 : i32
    %c0_i32_0 = arith.constant 0 : i32
    %c0_i32_1 = arith.constant 0 : i32
    %c0_i32_2 = arith.constant 0 : i32
    return %c0_i32, %c0_i32_0, %c0_i32_1 : i32, i32, i32
  }
  func.func @transform_2(%arg0: i32, %arg1: i32, %arg2: memref<1xi32, #tpu.memory_space<smem>>) -> (i32, i32, i32) {
    %c0_i32 = arith.constant 0 : i32
    %c0_i32_0 = arith.constant 0 : i32
    %c0_i32_1 = arith.constant 0 : i32
    %c0_i32_2 = arith.constant 0 : i32
    return %c0_i32, %c0_i32_0, %c0_i32_1 : i32, i32, i32
  }
  func.func @transform_3(%arg0: i32, %arg1: i32, %arg2: memref<1xi32, #tpu.memory_space<smem>>) -> (i32, i32, i32) {
    %c0_i32 = arith.constant 0 : i32
    %c0_i32_0 = arith.constant 0 : i32
    %c0_i32_1 = arith.constant 0 : i32
    %c0_i32_2 = arith.constant 0 : i32
    return %c0_i32, %c0_i32_0, %c0_i32_1 : i32, i32, i32
  }
  func.func @transform_4(%arg0: i32, %arg1: i32, %arg2: memref<1xi32, #tpu.memory_space<smem>>) -> (i32, i32, i32) {
    %c0_i32 = arith.constant 0 : i32
    %c0_i32_0 = arith.constant 0 : i32
    %c0_i32_1 = arith.constant 0 : i32
    %c0_i32_2 = arith.constant 0 : i32
    return %c0_i32, %c0_i32_0, %c0_i32_1 : i32, i32, i32
  }
  func.func @transform_5(%arg0: i32, %arg1: i32, %arg2: memref<1xi32, #tpu.memory_space<smem>>) -> (i32, i32, i32) {
    %c0_i32 = arith.constant 0 : i32
    %c0_i32_0 = arith.constant 0 : i32
    return %arg0, %c0_i32, %arg1 : i32, i32, i32
  }
}

</mosaic_0001>

<bundles_post_ra>
// kernel: tpu_custom_call.1
= control target key start
LH: loop header
LB: loop body
LE: loop exit
PB: predicated region body
PF: predicated region fallthrough
CT: control target
= control target key end

     0   :  { %12 = vsyncpa [#allocation5], 0  ;;  %s386_s0 = inlined_call_operand.<no memory space> [shape: s32[1], index: 0, kind: input, shape index: {}]   ;;  %s387_s1 = inlined_call_operand.hbm [shape: f32[2,4,256], index: 1, kind: input, shape index: {}]   ;;  %s388_s2 = inlined_call_operand.vmem [shape: f32[1,4,4], index: 2, kind: input, shape index: {}]   ;;  %s389_s3 = inlined_call_operand.vmem [shape: f32[1,4,1], index: 3, kind: input, shape index: {}]   ;;  %s390_s4 = inlined_call_operand.vmem [shape: f32[1,4,4], index: 4, kind: input, shape index: {}]   ;;  %s391_s5 = inlined_call_operand.vmem [shape: f32[1,4,1], index: 5, kind: input, shape index: {}]   ;;  %s392_s6 = inlined_call_operand.hbm [shape: f32[2,4,256], index: 6, kind: output, shape index: {}]  }
   0x1   :  { %13 = vsyncpa [#allocation6], 0  ;;  %s18_s22 = sshll.u32 %s387_s1, 4  ;;  %s319_s23 = smov [#allocation4]   ;;  %s19_s22 = int_to_ptr.hbm [resolvable:$true] %s18_s22 }
   0x2   :  { %s20_s24 = sshll.u32 %s319_s23, 4  ;;  %s320_s25 = smov 128   ;;  %s21_s24 = int_to_ptr.vmem [resolvable:$true] %s20_s24 }
   0x3   :  { %s321_s26 = smov 8  }
   0x4   :  { %26 = dma.hbm_to_vmem [thread:$0]  %s19_s22, 256, %s21_s24, [#allocation5], %s320_s25, %s320_s25, %s321_s26  }
   0x5   :  { %315 = dma.done.wait [#allocation5], 256  }
   0x6   :  { %316 = vsyncadd [#allocation5], 4294967040  ;;  %v322_v0 = vmov 1   ;;  %v323_v1 = vmov 0   ;;  %v324_v2 = vmov 2   ;;  %v325_v5 = vmov 3  }
   0x7   :  { %260 = vset.pattern.permute.xlu1 %v322_v0  ;;  %259 = vset.pattern.permute.xlu0 %v323_v1  ;;  %v41_v3 = vld [vmem:[%s388_s2] sm:$0xf]  ;;  %v40_v9 = vld [vmem:[#allocation4 + $0x8] sm:$0xff]  ;;  %vm225_vm0 = vcmask 1043456   ;;  %s238_s10 = sshll.u32 %s392_s6, 4  ;;  %s239_s10 = int_to_ptr.hbm [resolvable:$true] %s238_s10 }
   0x8   :  { %261 = vset.pattern.permute.xlu2 %v324_v2  ;;  %88 = vperm.xlu1 %260, %v41_v3   ;;  %v42_v4 = vld [vmem:[%s390_s4] sm:$0xf]  ;;  %v77_v13 = vperm.slane %v40_v9, 1  ;;  %v78_v14 = vperm.slane %v40_v9, 5  ;;  %v47_v18 = vperm.slane %v40_v9, 0  ;;  %v48_v19 = vperm.slane %v40_v9, 4 }
   0x9   :  { %59 = vperm.xlu0 %259, %v41_v3   ;;  %124 = vperm.xlu2 %261, %v41_v3   ;;  %v183_v6 = vld [vmem:[%s389_s3] sm:$0xf]  ;;  %v113_v22 = vperm.slane %v40_v9, 2  ;;  %v114_v23 = vperm.slane %v40_v9, 6  ;;  %v149_v39 = vperm.slane %v40_v9, 3  ;;  %v150_v40 = vperm.slane %v40_v9, 7 }
   0xa   :  { %v197_v7 = vld [vmem:[%s391_s5] sm:$0xf]  ;;  %v85_v27 = vperm.slane %v77_v13, 1  ;;  %v86_v28 = vperm.slane %v78_v14, 1  ;;  %v55_v31 = vperm.slane %v47_v18, 0  ;;  %v56_v32 = vperm.slane %v48_v19, 0 }
   0xb   :  { %v39_v8 = vld [vmem:[#allocation4] sm:$0xff]  ;;  %v121_v35 = vperm.slane %v113_v22, 2  ;;  %v122_v36 = vperm.slane %v114_v23, 2  ;;  %v157_v57 = vperm.slane %v149_v39, 3  ;;  %v158_v58 = vperm.slane %v150_v40, 3  ;;  %s326_s3 = smov [#allocation7]  }
   0xc   :  { %v75_v11 = vperm.slane %v39_v8, 1  ;;  %v76_v12 = vperm.slane %v39_v8, 5  ;;  %v45_v16 = vperm.slane %v39_v8, 0  ;;  %v46_v17 = vperm.slane %v39_v8, 4  ;;  %s236_s4 = sshll.u32 %s326_s3, 4  ;;  %s237_s4 = int_to_ptr.vmem [resolvable:$true] %s236_s4 }
   0xd   :  { %v111_v20 = vperm.slane %v39_v8, 2  ;;  %v112_v21 = vperm.slane %v39_v8, 6  ;;  %v147_v37 = vperm.slane %v39_v8, 3  ;;  %v148_v38 = vperm.slane %v39_v8, 7 }
   0xe   :  { %v83_v25 = vperm.slane %v75_v11, 1  ;;  %v84_v26 = vperm.slane %v76_v12, 1  ;;  %v53_v29 = vperm.slane %v45_v16, 0  ;;  %v54_v30 = vperm.slane %v46_v17, 0 }
   0xf   :  { %v119_v33 = vperm.slane %v111_v20, 2  ;;  %v120_v34 = vperm.slane %v112_v21, 2  ;;  %v155_v55 = vperm.slane %v147_v37, 3  ;;  %v156_v56 = vperm.slane %v148_v38, 3 }
  0x10   :  { %100 = vperm.xlu1 %260, %v42_v4  }
  0x11   :  { %68 = vperm.xlu0 %259, %v42_v4   ;;  %136 = vperm.xlu2 %261, %v42_v4  }
  0x18   :  { %263 = vset.pattern.permute.xlu1 %v325_v5 }
  0x19   :  { %262 = vset.pattern.permute.xlu0 %v325_v5  ;;  %172 = vperm.xlu1 %263, %v42_v4  }
  0x1a   :  { %160 = vperm.xlu0 %262, %v41_v3   ;;  %264 = vset.pattern.permute.xlu2 %v323_v1 }
  0x1b   :  { %186 = vperm.xlu2 %264, %v183_v6  }
  0x21   :  { %265 = vset.pattern.permute.xlu1 %v323_v1 }
  0x22   :  { %266 = vset.pattern.permute.xlu0 %v323_v1  ;;  %200 = vperm.xlu1 %265, %v197_v7  }
  0x63   :  { %v125_v24 = vpop.permute.xlu2 %124 }
  0x64   :  { %v127_v51 = vmul.f32 %v125_v24, %v119_v33  ;;  %v128_v52 = vmul.f32 %v125_v24, %v120_v34  ;;  %v129_v53 = vmul.f32 %v125_v24, %v121_v35  ;;  %v130_v54 = vmul.f32 %v125_v24, %v122_v36 }
  0x6b   :  { %v137_v63 = vpop.permute.xlu2 %136 }
  0x6c   :  { %v139_v8 = vmul.f32 %v137_v63, %v119_v33  ;;  %v140_v9 = vmul.f32 %v137_v63, %v120_v34  ;;  %v142_v11 = vmul.f32 %v137_v63, %v122_v36 }
  0x7a   :  { %v89_v10 = vpop.permute.xlu1 %88 }
  0x7b   :  { %v60_v15 = vpop.permute.xlu0 %59  ;;  %v91_v41 = vmul.f32 %v89_v10, %v83_v25  ;;  %v92_v42 = vmul.f32 %v89_v10, %v84_v26  ;;  %v93_v43 = vmul.f32 %v89_v10, %v85_v27  ;;  %v94_v44 = vmul.f32 %v89_v10, %v86_v28 }
  0x7c   :  { %v62_v47 = vmul.f32 %v60_v15, %v53_v29  ;;  %v63_v48 = vmul.f32 %v60_v15, %v54_v30  ;;  %v64_v49 = vmul.f32 %v60_v15, %v55_v31  ;;  %v65_v50 = vmul.f32 %v60_v15, %v56_v32 }
  0x7d   :  { %v141_v10 = vmul.f32 %v137_v63, %v121_v35 }
  0x7e   :  { %v95_v59 = vadd.f32 %v91_v41, %v62_v47  ;;  %v96_v60 = vadd.f32 %v92_v42, %v63_v48  ;;  %v97_v61 = vadd.f32 %v93_v43, %v64_v49  ;;  %v98_v62 = vadd.f32 %v94_v44, %v65_v50 }
  0x80   :  { %v131_v14 = vadd.f32 %v127_v51, %v95_v59  ;;  %v132_v15 = vadd.f32 %v128_v52, %v96_v60  ;;  %v133_v16 = vadd.f32 %v129_v53, %v97_v61  ;;  %v134_v17 = vadd.f32 %v130_v54, %v98_v62 }
  0x82   :  { %v101_v45 = vpop.permute.xlu1 %100 }
  0x83   :  { %v69_v46 = vpop.permute.xlu0 %68  ;;  %v103_v0 = vmul.f32 %v101_v45, %v83_v25  ;;  %v104_v1 = vmul.f32 %v101_v45, %v84_v26  ;;  %v105_v2 = vmul.f32 %v101_v45, %v85_v27  ;;  %v106_v3 = vmul.f32 %v101_v45, %v86_v28 }
  0x84   :  { %v71_v4 = vmul.f32 %v69_v46, %v53_v29  ;;  %v72_v5 = vmul.f32 %v69_v46, %v54_v30  ;;  %v73_v6 = vmul.f32 %v69_v46, %v55_v31  ;;  %v74_v7 = vmul.f32 %v69_v46, %v56_v32  ;;  %v187_v30 = vpop.permute.xlu2 %186 }
  0x86   :  { %v107_v22 = vadd.f32 %v103_v0, %v71_v4  ;;  %v108_v23 = vadd.f32 %v104_v1, %v72_v5  ;;  %v109_v24 = vadd.f32 %v105_v2, %v73_v6  ;;  %v110_v25 = vadd.f32 %v106_v3, %v74_v7 }
  0x88   :  { %v143_v35 = vadd.f32 %v139_v8, %v107_v22  ;;  %v144_v36 = vadd.f32 %v140_v9, %v108_v23  ;;  %v145_v37 = vadd.f32 %v141_v10, %v109_v24  ;;  %v146_v38 = vadd.f32 %v142_v11, %v110_v25 }
  0x8b   :  { %v173_v12 = vpop.permute.xlu1 %172 }
  0x8c   :  { %v161_v13 = vpop.permute.xlu0 %160  ;;  %v175_v31 = vmul.f32 %v173_v12, %v155_v55  ;;  %v176_v32 = vmul.f32 %v173_v12, %v156_v56  ;;  %v177_v33 = vmul.f32 %v173_v12, %v157_v57  ;;  %v178_v34 = vmul.f32 %v173_v12, %v158_v58 }
  0x8d   :  { %v163_v18 = vmul.f32 %v161_v13, %v155_v55  ;;  %v164_v19 = vmul.f32 %v161_v13, %v156_v56  ;;  %v165_v20 = vmul.f32 %v161_v13, %v157_v57  ;;  %v166_v21 = vmul.f32 %v161_v13, %v158_v58 }
  0x8e   :  { %v179_v43 = vadd.f32 %v175_v31, %v143_v35  ;;  %v180_v44 = vadd.f32 %v176_v32, %v144_v36  ;;  %v181_v45 = vadd.f32 %v177_v33, %v145_v37  ;;  %v182_v46 = vadd.f32 %v178_v34, %v146_v38 }
  0x8f   :  { %v167_v26 = vadd.f32 %v163_v18, %v131_v14  ;;  %v168_v27 = vadd.f32 %v164_v19, %v132_v15  ;;  %v169_v28 = vadd.f32 %v165_v20, %v133_v16  ;;  %v170_v29 = vadd.f32 %v166_v21, %v134_v17 }
  0x91   :  { %v189_v39 = vadd.f32 %v187_v30, %v167_v26  ;;  %v190_v40 = vadd.f32 %v187_v30, %v168_v27  ;;  %v191_v41 = vadd.f32 %v187_v30, %v169_v28  ;;  %v192_v42 = vadd.f32 %v187_v30, %v170_v29 }
  0x93   :  { %v193_v52 = vmax.f32 %v189_v39, 0.0  ;;  %v194_v53 = vmax.f32 %v190_v40, 0.0  ;;  %v195_v54 = vmax.f32 %v191_v41, 0.0  ;;  %v196_v55 = vmax.f32 %v192_v42, 0.0 }
  0x94   :  { %v201_v47 = vpop.permute.xlu1 %200 }
  0x95   :  { %v203_v48 = vadd.f32 %v201_v47, %v179_v43  ;;  %v204_v49 = vadd.f32 %v201_v47, %v180_v44  ;;  %v205_v50 = vadd.f32 %v201_v47, %v181_v45  ;;  %v206_v51 = vadd.f32 %v201_v47, %v182_v46 }
  0x97   :  { %v207_v56 = vmax.f32 %v203_v48, 0.0  ;;  %v208_v57 = vmax.f32 %v204_v49, 0.0  ;;  %v209_v58 = vmax.f32 %v205_v50, 0.0  ;;  %v210_v59 = vmax.f32 %v206_v51, 0.0 }
  0x99   :  { %v211_v60 = vadd.f32 %v207_v56, %v193_v52  ;;  %v212_v61 = vadd.f32 %v208_v57, %v194_v53  ;;  %v213_v62 = vadd.f32 %v209_v58, %v195_v54  ;;  %v214_v63 = vadd.f32 %v210_v59, %v196_v55 }
  0x9b   :  { %v216_v0 = vmul.f32 0.5, %v212_v61  ;;  %v218_v1 = vmul.f32 0.5, %v214_v63  ;;  %v215_v2 = vmul.f32 0.5, %v211_v60  ;;  %v217_v3 = vmul.f32 0.5, %v213_v62 }
  0x9d   :  { %v223_v4 = vrot.slane %v216_v0, 4  ;;  %v224_v5 = vrot.slane %v218_v1, 4 }
  0x9f   :  { %v226_v6 = vsel %vm225_vm0, %v215_v2, %v223_v4  ;;  %v227_v7 = vsel %vm225_vm0, %v217_v3, %v224_v5 }
  0xa0   :  { %230 = vst [vmem:[#allocation7] sm:$0xff] %v226_v6 }
  0xa1   :  { %231 = vst [vmem:[#allocation7 + $0x8] sm:$0xff] %v227_v7 }
  0xa2   :  { %244 = dma.vmem_to_hbm [thread:$0]  %s237_s4, 256, %s239_s10, [#allocation6], %s320_s25, %s320_s25, %s321_s26  }
  0xa3   :  { %317 = dma.done.wait [#allocation6], 256  }
  0xa4   :  { %318 = vsyncadd [#allocation6], 4294967040 }
  0xa5   :  { %249 = vsyncpa [#allocation5], 1 }
  0xa6   :  { %250 = vsyncpa [#allocation6], 1 }

</bundles_post_ra>
